<compile_context>
chip_gen: v6e
topology: v6e:2x2x1
jax: 0.10.0
libtpu: 0.0.40
codegen_flags: <defaults>
</compile_context>

<pallas_src>
import jax
import jax.numpy as jnp
from jax.experimental import pallas as pl
from jax.experimental.pallas import tpu as pltpu

# --- model dims (small, consistent with the module's forward) -----------------
B = 2          # batch
S = 8          # sequence length
H = 32         # hidden_size
V = 64         # vocab_size
ROWS = B * S   # 16 tokens -> single block (multiple of 8 sublanes)
OUT_W = 128    # lane-dense fused output width: [hidden(32) | logits(64) | reward(1) | pad]

# --- packed-constant layout (rows of the single (PACK_ROWS, 128) stream) ------
ROW_EMB = 0                  # rows [0, V)        : embedding table, lanes [H:) zero
ROW_WENC = V                 # rows [V, V+128)    : W_enc zero-padded to 128x128
ROW_WFUSED = V + OUT_W       # rows [V+128,V+256) : [eye(H) | W_tok | W_r | 0] padded
ROW_BENC = V + 2 * OUT_W     # row  V+256         : b_enc padded to 128 lanes
ROW_BFUSED = ROW_BENC + 1    # row  V+257         : fused bias [0 | b_tok | b_r | 0]
PACK_ROWS = ((ROW_BFUSED + 1 + 7) // 8) * 8       # 328, sublane-aligned


def world_model_kernel(ids_ref, mask_ref, const_ref, out_ref):
    rows = ids_ref.shape[0]

    # --- in-kernel embedding gather: one-hot (rows,V) @ emb_pad (V,128) on MXU
    ids = ids_ref[...]                                            # (rows, 1) int32
    iota = jax.lax.broadcasted_iota(jnp.int32, (rows, V), 1)
    onehot = jnp.where(ids == iota, 1.0, 0.0)                     # (rows, V) f32
    emb = jnp.dot(onehot, const_ref[ROW_EMB:ROW_EMB + V, :],
                  preferred_element_type=jnp.float32)             # (rows,128), lanes[H:) = 0

    # --- synthetic base_model: h = tanh(emb @ W_enc + b_enc), masked per position
    h = jnp.tanh(
        jnp.dot(emb, const_ref[ROW_WENC:ROW_WENC + OUT_W, :],
                preferred_element_type=jnp.float32)
        + const_ref[ROW_BENC:ROW_BENC + 1, :])                    # (rows, 128)
    h = h * mask_ref[...]                                         # (rows,128) * (rows,1)

    # --- fused heads: one MXU pass -> [hidden | token_logits | reward | pad]
    slab = (jnp.dot(h, const_ref[ROW_WFUSED:ROW_WFUSED + OUT_W, :],
                    preferred_element_type=jnp.float32)
            + const_ref[ROW_BFUSED:ROW_BFUSED + 1, :])
    out_ref[...] = slab.astype(out_ref.dtype)                     # (rows,128) unmasked store


def pack_params(params):
    """Build the single lane-dense constant stream ONCE (hoisted off the hot path)."""
    cp = jnp.zeros((PACK_ROWS, OUT_W), jnp.float32)
    # embedding table (V, H) -> lanes [0:H)
    cp = cp.at[ROW_EMB:ROW_EMB + V, 0:H].set(params["embedding"])
    # encoder weight (H, H) -> top-left corner of a 128x128 zero block
    cp = cp.at[ROW_WENC:ROW_WENC + H, 0:H].set(params["w_enc"])
    # fused head weight rows [0:H): [identity | W_tok | W_r | 0]
    cp = cp.at[ROW_WFUSED:ROW_WFUSED + H, 0:H].set(jnp.eye(H, dtype=jnp.float32))
    cp = cp.at[ROW_WFUSED:ROW_WFUSED + H, H:H + V].set(params["w_tok"])
    cp = cp.at[ROW_WFUSED:ROW_WFUSED + H, H + V:H + V + 1].set(params["w_r"])
    # biases
    cp = cp.at[ROW_BENC, 0:H].set(params["b_enc"][0])
    cp = cp.at[ROW_BFUSED, H:H + V].set(params["b_tok"][0])
    cp = cp.at[ROW_BFUSED, H + V].set(params["b_r"][0, 0])
    return cp


@jax.jit
def world_model_forward(input_ids, attention_mask, const_pack):
    Bq, Sq = input_ids.shape
    rows = Bq * Sq

    ids_col = input_ids.reshape(rows, 1).astype(jnp.int32)        # (rows, 1)
    mask_col = attention_mask.reshape(rows, 1).astype(jnp.float32)  # (rows, 1)

    full = lambda i: (0, 0)
    slab = pl.pallas_call(
        world_model_kernel,
        out_shape=jax.ShapeDtypeStruct((rows, OUT_W), jnp.float32),
        grid_spec=pltpu.PrefetchScalarGridSpec(
            num_scalar_prefetch=0,
            grid=(1,),                                    # single step: no pipeline overhead
            in_specs=[
                pl.BlockSpec((rows, 1), full),            # input_ids column
                pl.BlockSpec((rows, 1), full),            # attention_mask column
                pl.BlockSpec((PACK_ROWS, OUT_W), full),   # packed constants (one stream)
            ],
            out_specs=pl.BlockSpec((rows, OUT_W), full),  # one lane-dense output slab
        ),
        compiler_params=pltpu.CompilerParams(
            dimension_semantics=("arbitrary",)),          # don't shard 16 rows across TCs
    )(ids_col, mask_col, const_pack)

    hidden = slab[:, 0:H]
    logits = slab[:, H:H + V]
    reward = slab[:, H + V:H + V + 1]
    return {
        "token_logits": logits.reshape(Bq, Sq, V),
        "reward_estimates": reward.reshape(Bq, Sq, 1),
        "hidden_states": hidden.reshape(Bq, Sq, H),
    }


def init_params(key):
    ks = jax.random.split(key, 7)
    scale = 0.02
    return {
        "embedding": scale * jax.random.normal(ks[0], (V, H), jnp.float32),
        "w_enc":     scale * jax.random.normal(ks[1], (H, H), jnp.float32),
        "b_enc":     jnp.zeros((1, H), jnp.float32),
        "w_tok":     scale * jax.random.normal(ks[2], (H, V), jnp.float32),
        "b_tok":     scale * jax.random.normal(ks[3], (1, V), jnp.float32),
        "w_r":       scale * jax.random.normal(ks[4], (H, 1), jnp.float32),
        "b_r":       scale * jax.random.normal(ks[5], (1, 1), jnp.float32),
    }


def reference_forward(input_ids, attention_mask, params):
    emb = params["embedding"][input_ids]                              # (B,S,H)
    h = jnp.tanh(emb @ params["w_enc"] + params["b_enc"][0])
    h = h * attention_mask[..., None].astype(jnp.float32)
    logits = h @ params["w_tok"] + params["b_tok"][0]
    reward = h @ params["w_r"] + params["b_r"][0]
    return {"token_logits": logits, "reward_estimates": reward, "hidden_states": h}


if __name__ == "__main__":
    key = jax.random.PRNGKey(0)
    k_ids, k_mask, k_params = jax.random.split(key, 3)

    params = init_params(k_params)
    # packed constants built ONCE (load-time), not per forward call
    const_pack = jax.block_until_ready(pack_params(params))

    input_ids = jax.random.randint(k_ids, (B, S), 0, V, dtype=jnp.int32)
    # attention_mask with a couple of padded positions
    attention_mask = jnp.ones((B, S), jnp.int32).at[:, -2:].set(0)

    out = world_model_forward(input_ids, attention_mask, const_pack)
    jax.block_until_ready(out)

    ref = reference_forward(input_ids, attention_mask, params)
    assert jnp.allclose(out["token_logits"], ref["token_logits"], atol=1e-5)
    assert jnp.allclose(out["reward_estimates"], ref["reward_estimates"], atol=1e-5)
    assert jnp.allclose(out["hidden_states"], ref["hidden_states"], atol=1e-5)
    assert out["token_logits"].shape == (B, S, V)
    assert out["reward_estimates"].shape == (B, S, 1)
    assert out["hidden_states"].shape == (B, S, H)

    print("KERNEL_OK")
</pallas_src>

<mosaic_0001>
module attributes {stable_mosaic.version = 11 : i64} {
  func.func @world_model_kernel(%arg0: i32, %arg1: memref<16x1xi32, #tpu.memory_space<vmem>>, %arg2: memref<16x1xf32, #tpu.memory_space<vmem>>, %arg3: memref<328x128xf32, #tpu.memory_space<vmem>>, %arg4: memref<16x128xf32, #tpu.memory_space<vmem>>) attributes {dimension_semantics = [#tpu.dimension_semantics<arbitrary>], iteration_bounds = array<i64: 1>, scalar_prefetch = 0 : i64, scratch_operands = 0 : i64, tpu.core_type = #tpu.core_type<tc>, window_params = [{pipeline_mode = #tpu.pipeline_mode<synchronous>, transform_indices = @transform_0, window_bounds = array<i64: 16, 1>}, {pipeline_mode = #tpu.pipeline_mode<synchronous>, transform_indices = @transform_1, window_bounds = array<i64: 16, 1>}, {pipeline_mode = #tpu.pipeline_mode<synchronous>, transform_indices = @transform_2, window_bounds = array<i64: 328, 128>}, {pipeline_mode = #tpu.pipeline_mode<synchronous>, transform_indices = @transform_3, window_bounds = array<i64: 16, 128>}]} {
    %c0 = arith.constant 0 : index
    %c0_0 = arith.constant 0 : index
    %0 = vector.load %arg1[%c0, %c0_0] : memref<16x1xi32, #tpu.memory_space<vmem>>, vector<16x1xi32>
    %1 = tpu.iota {dimensions = array<i32: 1>} : vector<16x64xi32>
    %2 = vector.broadcast %0 : vector<16x1xi32> to vector<16x64xi32>
    %3 = arith.cmpi eq, %2, %1 : vector<16x64xi32>
    %cst = arith.constant 1.000000e+00 : f32
    %cst_1 = arith.constant 0.000000e+00 : f32
    %4 = vector.broadcast %cst : f32 to vector<16x64xf32>
    %5 = vector.broadcast %cst_1 : f32 to vector<16x64xf32>
    %6 = arith.select %3, %4, %5 : vector<16x64xi1>, vector<16x64xf32>
    %c0_2 = arith.constant 0 : index
    %c0_3 = arith.constant 0 : index
    %7 = vector.load %arg3[%c0_2, %c0_3] : memref<328x128xf32, #tpu.memory_space<vmem>>, vector<64x128xf32>
    %cst_4 = arith.constant dense<0.000000e+00> : vector<16x128xf32>
    %8 = tpu.matmul %6, %7, %cst_4 {dimension_numbers = #tpu.dot_dimension_numbers<[1], [0], [0], [1], [0, 0, 1, 1], [], []>} : vector<16x64xf32>, vector<64x128xf32>, vector<16x128xf32> -> vector<16x128xf32>
    %c64 = arith.constant 64 : index
    %c0_5 = arith.constant 0 : index
    %9 = vector.load %arg3[%c64, %c0_5] : memref<328x128xf32, #tpu.memory_space<vmem>>, vector<128x128xf32>
    %cst_6 = arith.constant dense<0.000000e+00> : vector<16x128xf32>
    %10 = tpu.matmul %8, %9, %cst_6 {dimension_numbers = #tpu.dot_dimension_numbers<[1], [0], [0], [1], [0, 0, 1, 1], [], []>} : vector<16x128xf32>, vector<128x128xf32>, vector<16x128xf32> -> vector<16x128xf32>
    %c320 = arith.constant 320 : index
    %c0_7 = arith.constant 0 : index
    %11 = vector.load %arg3[%c320, %c0_7] : memref<328x128xf32, #tpu.memory_space<vmem>>, vector<1x128xf32>
    %12 = vector.broadcast %11 : vector<1x128xf32> to vector<16x128xf32>
    %13 = arith.addf %10, %12 : vector<16x128xf32>
    %14 = math.tanh %13 : vector<16x128xf32>
    %c0_8 = arith.constant 0 : index
    %c0_9 = arith.constant 0 : index
    %15 = vector.load %arg2[%c0_8, %c0_9] : memref<16x1xf32, #tpu.memory_space<vmem>>, vector<16x1xf32>
    %16 = vector.broadcast %15 : vector<16x1xf32> to vector<16x128xf32>
    %17 = arith.mulf %14, %16 : vector<16x128xf32>
    %c192 = arith.constant 192 : index
    %c0_10 = arith.constant 0 : index
    %18 = vector.load %arg3[%c192, %c0_10] : memref<328x128xf32, #tpu.memory_space<vmem>>, vector<128x128xf32>
    %cst_11 = arith.constant dense<0.000000e+00> : vector<16x128xf32>
    %19 = tpu.matmul %17, %18, %cst_11 {dimension_numbers = #tpu.dot_dimension_numbers<[1], [0], [0], [1], [0, 0, 1, 1], [], []>} : vector<16x128xf32>, vector<128x128xf32>, vector<16x128xf32> -> vector<16x128xf32>
    %c321 = arith.constant 321 : index
    %c0_12 = arith.constant 0 : index
    %20 = vector.load %arg3[%c321, %c0_12] : memref<328x128xf32, #tpu.memory_space<vmem>>, vector<1x128xf32>
    %21 = vector.broadcast %20 : vector<1x128xf32> to vector<16x128xf32>
    %22 = arith.addf %19, %21 : vector<16x128xf32>
    %c0_13 = arith.constant 0 : index
    %c0_14 = arith.constant 0 : index
    %23 = vector.load %arg4[%c0_13, %c0_14] : memref<16x128xf32, #tpu.memory_space<vmem>>, vector<16x128xf32>
    tpu.vector_store %arg4[%c0_13, %c0_14], %22 {strides = array<i32>} : memref<16x128xf32, #tpu.memory_space<vmem>>, vector<16x128xf32>,
    return
  }
  func.func @transform_0(%arg0: i32) -> (i32, i32) {
    %c0_i32 = arith.constant 0 : i32
    %c0_i32_0 = arith.constant 0 : i32
    %c0_i32_1 = arith.constant 0 : i32
    return %c0_i32, %c0_i32_0 : i32, i32
  }
  func.func @transform_1(%arg0: i32) -> (i32, i32) {
    %c0_i32 = arith.constant 0 : i32
    %c0_i32_0 = arith.constant 0 : i32
    %c0_i32_1 = arith.constant 0 : i32
    return %c0_i32, %c0_i32_0 : i32, i32
  }
  func.func @transform_2(%arg0: i32) -> (i32, i32) {
    %c0_i32 = arith.constant 0 : i32
    %c0_i32_0 = arith.constant 0 : i32
    %c0_i32_1 = arith.constant 0 : i32
    return %c0_i32, %c0_i32_0 : i32, i32
  }
  func.func @transform_3(%arg0: i32) -> (i32, i32) {
    %c0_i32 = arith.constant 0 : i32
    %c0_i32_0 = arith.constant 0 : i32
    %c0_i32_1 = arith.constant 0 : i32
    return %c0_i32, %c0_i32_0 : i32, i32
  }
}

</mosaic_0001>

<bundles_post_ra>
// kernel: world_model_forward.1
= control target key start
LH: loop header
LB: loop body
LE: loop exit
PB: predicated region body
PF: predicated region fallthrough
CT: control target
= control target key end

     0   :  { %8 = vsyncpa [#allocation3], 0  ;;  %s519_s12 = smov [#allocation2]   ;;  %s565_s0 = inlined_call_operand.vmem [shape: s32[16,1], index: 0, kind: input, shape index: {}]   ;;  %s566_s1 = inlined_call_operand.vmem [shape: f32[16,1], index: 1, kind: input, shape index: {}]   ;;  %s567_s2 = inlined_call_operand.hbm [shape: f32[328,128], index: 2, kind: input, shape index: {}]   ;;  %s568_s3 = inlined_call_operand.vmem [shape: f32[16,128], index: 3, kind: output, shape index: {}]  }
   0x1   :  { %s18_s13 = sshll.u32 %s519_s12, 4  ;;  %s19_s13 = int_to_ptr.vmem [resolvable:$true] %s18_s13 }
   0x2   :  { %s505_s14 = scalar_lea.vmem %s19_s13, 5248  ;;  %p510_p1 = scmp.lt.s32.totalorder %s19_s13, %s19_s13 }
   0x3   :  { %p506_p0 = scmp.ne.s32.totalorder %s19_s13, %s505_s14  ;;  %p511_p2 = scmp.lt.s32.totalorder %s505_s14, %s505_s14 }
   0x5   :  { %p512_p3 = por %p511_p2, %p510_p1 }
   0x7   :  { %p513_p4 = pnand %p512_p3, %p506_p0 }
   0x9   :  { %516 = shalt.err (!%p513_p4)
}
   0xa   :  { %s520_s15 = smov 128   ;;  %s521_s16 = smov 8  }
   0xb   :  { %24 = dma.hbm_to_vmem [thread:$0]  %s567_s2, 5248, %s19_s13, [#allocation3], %s520_s15, %s520_s15, %s521_s16  }
   0xc   :  { %517 = dma.done.wait [#allocation3], 5248  }
   0xd   :  { %518 = vsyncadd [#allocation3], 4294962048  ;;  %v522_v0 = vmov 0   ;;  %v28_v1 = vld [vmem:[%s565_s0] sm:$0xff]  ;;  %v49_v2 = vld [vmem:[#allocation2 + $0x38] sm:$0xff]  ;;  %v30_v25 = vlaneseq  ;;  %vm50_vm0 = vcmask 523264  }
   0xe   :  { %491 = vset.pattern.permute.xlu0 %v522_v0  ;;  %492 = vset.pattern.permute.xlu1 %v522_v0  ;;  %v48_v3 = vld [vmem:[#allocation2 + $0x30] sm:$0xff]  ;;  %v29_v4 = vld [vmem:[%s565_s0 + $0x8] sm:$0xff]  ;;  %v147_v6 = vld [vmem:[#allocation2 + $0xb8] sm:$0xff]  ;;  %v523_v28 = vmov 0.0  }
   0xf   :  { %33 = vperm.xlu0 %491, %v28_v1   ;;  %397 = vmatprep.subr.mxu0 %v49_v2  ;;  %v47_v5 = vld [vmem:[#allocation2 + $0x28] sm:$0xff]  ;;  %v46_v7 = vld [vmem:[#allocation2 + $0x20] sm:$0xff]  ;;  %v146_v8 = vld [vmem:[#allocation2 + $0xb0] sm:$0xff]  ;;  %v31_v26 = vand.u32 127, %v30_v25 }
  0x10   :  { %398 = vmatpush3.msra.mxu0 %v49_v2  ;;  %416 = vmatprep.subr.mxu1 %v147_v6  ;;  %v45_v9 = vld [vmem:[#allocation2 + $0x18] sm:$0xff]  ;;  %v145_v10 = vld [vmem:[#allocation2 + $0xa8] sm:$0xff]  ;;  %v44_v11 = vld [vmem:[#allocation2 + $0x10] sm:$0xff] }
  0x11   :  { %399 = vmatprep.subr.mxu0 %v48_v3  ;;  %417 = vmatpush3.msra.mxu1 %v147_v6  ;;  %v144_v12 = vld [vmem:[#allocation2 + $0xa0] sm:$0xff]  ;;  %v43_v13 = vld [vmem:[#allocation2 + $0x8] sm:$0xff]  ;;  %v143_v14 = vld [vmem:[#allocation2 + $0x98] sm:$0xff] }
  0x12   :  { %400 = vmatpush3.msra.mxu0 %v48_v3  ;;  %418 = vmatprep.subr.mxu1 %v146_v8  ;;  %v42_v15 = vld [vmem:[#allocation2] sm:$0xff]  ;;  %v142_v16 = vld [vmem:[#allocation2 + $0x90] sm:$0xff]  ;;  %v141_v17 = vld [vmem:[#allocation2 + $0x88] sm:$0xff] }
  0x13   :  { %36 = vperm.xlu0 %491, %v29_v4   ;;  %401 = vmatprep.subr.mxu0 %v47_v5  ;;  %v140_v18 = vld [vmem:[#allocation2 + $0x80] sm:$0xff]  ;;  %v139_v19 = vld [vmem:[#allocation2 + $0x78] sm:$0xff]  ;;  %v138_v20 = vld [vmem:[#allocation2 + $0x70] sm:$0xff] }
  0x14   :  { %402 = vmatpush3.msra.mxu0 %v47_v5  ;;  %419 = vmatpush3.msra.mxu1 %v146_v8  ;;  %v137_v21 = vld [vmem:[#allocation2 + $0x68] sm:$0xff]  ;;  %v136_v22 = vld [vmem:[#allocation2 + $0x60] sm:$0xff]  ;;  %v135_v23 = vld [vmem:[#allocation2 + $0x58] sm:$0xff] }
  0x15   :  { %403 = vmatprep.subr.mxu0 %v46_v7  ;;  %420 = vmatprep.subr.mxu1 %v145_v10  ;;  %v134_v24 = vld [vmem:[#allocation2 + $0x50] sm:$0xff]  ;;  %v133_v32 = vld [vmem:[#allocation2 + $0x48] sm:$0xff]  ;;  %v132_v33 = vld [vmem:[#allocation2 + $0x40] sm:$0xff] }
  0x16   :  { %404 = vmatpush3.msra.mxu0 %v46_v7  ;;  %421 = vmatpush3.msra.mxu1 %v145_v10  ;;  %v230_v34 = vld [vmem:[%s566_s1] sm:$0xff]  ;;  %v259_v35 = vld [vmem:[#allocation2 + $0x138] sm:$0xff]  ;;  %v258_v36 = vld [vmem:[#allocation2 + $0x130] sm:$0xff] }
  0x17   :  { %405 = vmatprep.subr.mxu0 %v45_v9  ;;  %422 = vmatprep.subr.mxu1 %v144_v12  ;;  %v231_v37 = vld [vmem:[%s566_s1 + $0x8] sm:$0xff]  ;;  %v256_v39 = vld [vmem:[#allocation2 + $0x120] sm:$0xff]  ;;  %v255_v40 = vld [vmem:[#allocation2 + $0x118] sm:$0xff] }
  0x18   :  { %406 = vmatpush3.msra.mxu0 %v45_v9  ;;  %423 = vmatpush3.msra.mxu1 %v144_v12  ;;  %v257_v38 = vld [vmem:[#allocation2 + $0x128] sm:$0xff]  ;;  %v254_v43 = vld [vmem:[#allocation2 + $0x110] sm:$0xff]  ;;  %v252_v45 = vld [vmem:[#allocation2 + $0x100] sm:$0xff] }
  0x19   :  { %407 = vmatprep.subr.mxu0 %v44_v11  ;;  %424 = vmatprep.subr.mxu1 %v143_v14  ;;  %v253_v44 = vld [vmem:[#allocation2 + $0x108] sm:$0xff]  ;;  %v251_v46 = vld [vmem:[#allocation2 + $0xf8] sm:$0xff]  ;;  %v250_v47 = vld [vmem:[#allocation2 + $0xf0] sm:$0xff] }
  0x1a   :  { %408 = vmatpush3.msra.mxu0 %v44_v11  ;;  %425 = vmatpush3.msra.mxu1 %v143_v14  ;;  %v249_v48 = vld [vmem:[#allocation2 + $0xe8] sm:$0xff]  ;;  %v248_v49 = vld [vmem:[#allocation2 + $0xe0] sm:$0xff]  ;;  %v247_v50 = vld [vmem:[#allocation2 + $0xd8] sm:$0xff] }
  0x1b   :  { %409 = vmatprep.subr.mxu0 %v43_v13  ;;  %426 = vmatprep.subr.mxu1 %v142_v16  ;;  %v246_v51 = vld [vmem:[#allocation2 + $0xd0] sm:$0xff]  ;;  %v245_v52 = vld [vmem:[#allocation2 + $0xc8] sm:$0xff]  ;;  %v244_v53 = vld [vmem:[#allocation2 + $0xc0] sm:$0xff] }
  0x1c   :  { %410 = vmatpush3.msra.mxu0 %v43_v13  ;;  %427 = vmatpush3.msra.mxu1 %v142_v16  ;;  %v349_v54 = vld [vmem:[#allocation2 + $0x140] ss:$0 sm:$0xff]  ;;  %v350_v1 = vld [vmem:[#allocation2 + $0x141] ss:$0 sm:$0xff] }
  0x1d   :  { %411 = vmatprep.subr.mxu0 %v42_v15  ;;  %428 = vmatprep.subr.mxu1 %v141_v17 }
  0x1e   :  { %412 = vmatpush3.msra.mxu0 %v42_v15  ;;  %429 = vmatpush3.msra.mxu1 %v141_v17 }
  0x1f   :  { %430 = vmatprep.subr.mxu1 %v140_v18  ;;  %234 = vperm.xlu1 %492, %v230_v34  }
  0x20   :  { %431 = vmatpush3.msra.mxu1 %v140_v18  ;;  %451 = vmatprep.subr.mxu0 %v259_v35 }
  0x21   :  { %432 = vmatprep.subr.mxu1 %v139_v19 }
  0x22   :  { %433 = vmatpush3.msra.mxu1 %v139_v19 }
  0x23   :  { %434 = vmatprep.subr.mxu1 %v138_v20  ;;  %239 = vperm.xlu1 %492, %v231_v37  }
  0x24   :  { %435 = vmatpush3.msra.mxu1 %v138_v20 }
  0x25   :  { %436 = vmatprep.subr.mxu1 %v137_v21 }
  0x26   :  { %437 = vmatpush3.msra.mxu1 %v137_v21 }
  0x27   :  { %438 = vmatprep.subr.mxu1 %v136_v22 }
  0x28   :  { %439 = vmatpush3.msra.mxu1 %v136_v22 }
  0x29   :  { %440 = vmatprep.subr.mxu1 %v135_v23 }
  0x2a   :  { %441 = vmatpush3.msra.mxu1 %v135_v23 }
  0x2b   :  { %442 = vmatprep.subr.mxu1 %v134_v24 }
  0x2c   :  { %443 = vmatpush3.msra.mxu1 %v134_v24 }
  0x2d   :  { %444 = vmatprep.subr.mxu1 %v133_v32 }
  0x2e   :  { %445 = vmatpush3.msra.mxu1 %v133_v32 }
  0x2f   :  { %446 = vmatprep.subr.mxu1 %v132_v33 }
  0x30   :  { %447 = vmatpush3.msra.mxu1 %v132_v33 }
  0x8a   :  { %v34_v27 = vpop.permute.xlu0 %33 }
  0x8b   :  { %vm38_vm1 = vcmp.eq.s32.totalorder %v34_v27, %v31_v26 }
  0x8c   :  { %v40_v29 = vsel %vm38_vm1, 1.0, %v523_v28 }
  0x8d   :  { %413 = vmatprep.mubr.msk.f32.mxu0 %vm50_vm0, %v40_v29 }
  0x8e   :  { %v37_v30 = vpop.permute.xlu0 %36 }
  0x8f   :  { %vm39_vm2 = vcmp.eq.s32.totalorder %v37_v30, %v31_v26 }
  0x90   :  { %v41_v31 = vsel %vm39_vm2, 1.0, %v523_v28 }
  0x91   :  { %414 = vmatmul.mubr.msk.f32.vlgmr.msra.gmra.mxu0 %vm50_vm0, %v41_v31 }
  0x92   :  { %452 = vmatpush3.msra.mxu0 %v259_v35 }
  0x93   :  { %453 = vmatprep.subr.mxu0 %v258_v36 }
  0x94   :  { %454 = vmatpush3.msra.mxu0 %v258_v36 }
  0x95   :  { %455 = vmatprep.subr.mxu0 %v257_v38 }
  0x96   :  { %456 = vmatpush3.msra.mxu0 %v257_v38 }
  0x97   :  { %457 = vmatprep.subr.mxu0 %v256_v39 }
  0x98   :  { %458 = vmatpush3.msra.mxu0 %v256_v39 }
  0x99   :  { %459 = vmatprep.subr.mxu0 %v255_v40 }
  0x9a   :  { %460 = vmatpush3.msra.mxu0 %v255_v40  ;;  %v235_v59 = vpop.permute.xlu1 %234 }
  0x9b   :  { %461 = vmatprep.subr.mxu0 %v254_v43 }
  0x9c   :  { %462 = vmatpush3.msra.mxu0 %v254_v43 }
  0x9d   :  { %463 = vmatprep.subr.mxu0 %v253_v44 }
  0x9e   :  { %464 = vmatpush3.msra.mxu0 %v253_v44  ;;  %v240_v61 = vpop.permute.xlu1 %239 }
  0x9f   :  { %465 = vmatprep.subr.mxu0 %v252_v45 }
  0xa0   :  { %466 = vmatpush3.msra.mxu0 %v252_v45 }
  0xa1   :  { %467 = vmatprep.subr.mxu0 %v251_v46 }
  0xa2   :  { %468 = vmatpush3.msra.mxu0 %v251_v46 }
  0xa3   :  { %469 = vmatprep.subr.mxu0 %v250_v47 }
  0xa4   :  { %470 = vmatpush3.msra.mxu0 %v250_v47 }
  0xa5   :  { %471 = vmatprep.subr.mxu0 %v249_v48 }
  0xa6   :  { %472 = vmatpush3.msra.mxu0 %v249_v48 }
  0xa7   :  { %473 = vmatprep.subr.mxu0 %v248_v49 }
  0xa8   :  { %474 = vmatpush3.msra.mxu0 %v248_v49 }
  0xa9   :  { %475 = vmatprep.subr.mxu0 %v247_v50 }
  0xaa   :  { %476 = vmatpush3.msra.mxu0 %v247_v50 }
  0xab   :  { %477 = vmatprep.subr.mxu0 %v246_v51 }
  0xac   :  { %478 = vmatpush3.msra.mxu0 %v246_v51 }
  0xad   :  { %479 = vmatprep.subr.mxu0 %v245_v52 }
  0xae   :  { %480 = vmatpush3.msra.mxu0 %v245_v52 }
  0xaf   :  { %481 = vmatprep.subr.mxu0 %v244_v53 }
  0xb0   :  { %482 = vmatpush3.msra.mxu0 %v244_v53 }
 0x151   :  { %v415_v41 = vpop.f32.mrf.mxu0 }
 0x153   :  { %v123_v42 = vpop.f32.mrf.mxu0 }
 0x154   :  { %448 = vmatprep.mubr.f32.mxu1 %v123_v42 }
 0x155   :  { %449 = vmatmul.mubr.f32.vlgmr.msra.gmra.mxu1 %v415_v41 }
 0x215   :  { %v450_v55 = vpop.f32.mrf.mxu1 }
 0x216   :  { %v225_v56 = vadd.f32 %v450_v55, %v349_v54 }
 0x217   :  { %v219_v57 = vpop.f32.mrf.mxu1 }
 0x218   :  { %v220_v58 = vadd.f32 %v349_v54, %v219_v57  ;;  %493 = vtanh.f32 %v225_v56 }
 0x21a   :  { %495 = vtanh.f32 %v220_v58 }
 0x225   :  { %v494_v60 = vpop.eup %493 }
 0x226   :  { %v243_v0 = vmul.f32 %v494_v60, %v240_v61 }
 0x227   :  { %v496_v62 = vpop.eup %495 }
 0x228   :  { %v242_v63 = vmul.f32 %v496_v62, %v235_v59 }
 0x22a   :  { %483 = vmatprep.mubr.f32.mxu0 %v242_v63 }
 0x22b   :  { %484 = vmatmul.mubr.f32.vlgmr.msra.gmra.mxu0 %v243_v0 }
 0x2eb   :  { %v485_v2 = vpop.f32.mrf.mxu0 }
 0x2ec   :  { %v337_v3 = vadd.f32 %v485_v2, %v350_v1 }
 0x2ed   :  { %v331_v4 = vpop.f32.mrf.mxu0 }
 0x2ee   :  { %341 = vst [vmem:[%s568_s3 + $0x8] sm:$0xff] %v337_v3  ;;  %v332_v5 = vadd.f32 %v350_v1, %v331_v4 }
 0x2f0   :  { %340 = vst [vmem:[%s568_s3] sm:$0xff] %v332_v5 }
 0x2f1   :  { %346 = vsyncpa [#allocation3], 1 }

</bundles_post_ra>
